<compile_context>
chip_gen: v7x
topology: tpu7x:2x2x1
jax: 0.10.0
libtpu: 0.0.40
codegen_flags: <defaults>
</compile_context>

<pallas_src>
import functools

import jax
import jax.numpy as jnp
from jax.experimental import pallas as pl
from jax.experimental.pallas import tpu as pltpu


def _round_up(x, m):
    return ((x + m - 1) // m) * m


def _vmem_capacity_bytes():
    try:
        return int(pltpu.get_tpu_info().vmem_capacity_bytes)
    except Exception:
        return 64 << 20  # conservative: v7x has 64 MiB per TensorCore


def _default_row_tile():
    try:
        kind = jax.devices()[0].device_kind.lower()
    except Exception:
        return 128
    # <= v5 generations have a 128x128 MXU -> TM=128; v6e/v7x (256x256) -> TM=256.
    return 128 if any(t in kind for t in ("v2", "v3", "v4", "v5")) else 256


def _gcn_fused_kernel(w_ref, b_ref, feat_hbm, a_ref, o_ref, h_scr, *rest,
                      n_layers, tm, out_pad, a_resident):
    """Grid point (l, r): row tile r of layer l.

    w_ref    : (1, F_pad, F_pad) bf16  weights of layer l (zero padded)
    b_ref    : (1, 1,  F_pad)    f32   bias of layer l (zero padded)
    feat_hbm : (N_pad, F_pad)    bf16  input features, raw HBM ref (pl.ANY)
    a_ref    : resident -> (N_pad, N_pad) bf16 raw HBM ref (pl.ANY)
               streamed -> (TM,   N_pad) bf16 VMEM row tile of A_hat
    o_ref    : (TM, out_pad)     f32   output row tile (written on last layer only)
    h_scr    : (2, N_pad, F_pad) bf16  ping-pong hidden-state buffer
    rest     : [a_vmem (N_pad, N_pad) bf16]  (resident path only), dma sems (2,)
    """
    if a_resident:
        a_vmem, sem = rest
    else:
        (sem,) = rest

    l = pl.program_id(0)
    r = pl.program_id(1)
    out_slot = l % 2
    in_slot = 1 - out_slot
    is_last = l == n_layers - 1

    # One-shot DMAs at the very first grid step: features -> layer-0 input slot,
    # and (fast path) the whole normalized adjacency -> VMEM residency.
    @pl.when(jnp.logical_and(l == 0, r == 0))
    def _():
        feat_cp = pltpu.make_async_copy(feat_hbm, h_scr.at[1], sem.at[0])
        feat_cp.start()
        if a_resident:
            a_cp = pltpu.make_async_copy(a_ref, a_vmem, sem.at[1])
            a_cp.start()
            a_cp.wait()
        feat_cp.wait()

    row0 = pl.multiple_of(r * tm, tm)
    if a_resident:
        a_tile = a_vmem[pl.ds(row0, tm), :]          # (TM, N_pad) bf16
    else:
        a_tile = a_ref[...]                          # (TM, N_pad) bf16

    h_in = h_scr[in_slot]                            # (N_pad, F_pad) bf16
    w = w_ref[0]                                     # (F_pad, F_pad) bf16
    b = b_ref[0]                                     # (1, F_pad)     f32

    # Aggregate, then transform: (A_r @ H) @ W, f32 accumulation on the MXU.
    # With row-tiled A this avoids recomputing H @ W per tile.
    # TODO(synk): per-layer feature widths (HW-first at f_out_pad[l]) would shrink
    # the N^2 matmul when in_dim >> hid_dim; kept a single uniform width here.
    agg = jnp.dot(a_tile, h_in, preferred_element_type=jnp.float32)
    z = jnp.dot(agg.astype(jnp.bfloat16), w, preferred_element_type=jnp.float32) + b

    # Intermediate layers: ReLU and store into the other ping-pong slot.
    # (Padded rows of H become relu(b); harmless because the matching A_hat
    #  columns are zero for all real rows and the caller slices [:n, :out_dim].)
    @pl.when(jnp.logical_not(is_last))
    def _():
        h_scr[out_slot, pl.ds(row0, tm), :] = jnp.maximum(z, 0.0).astype(jnp.bfloat16)

    # Last layer: no activation; write back only the (narrow) padded output width.
    @pl.when(is_last)
    def _():
        o_ref[...] = z[:, :out_pad]


def gcn_forward(a_hat, features, params, *, tm=None):
    """Fused GCN forward. Returns f32 [N, out_dim]."""
    n, in_dim = features.shape
    out_dim = params[-1][0].shape[1]
    n_layers = len(params)

    if tm is None:
        tm = _default_row_tile()

    dims = [in_dim] + [w.shape[1] for w, _ in params]
    f_pad = _round_up(max(dims), 128)          # lane-dense hidden/feature width
    out_pad = _round_up(out_dim, 128)          # decoupled (narrower) output width
    n_pad = _round_up(n, tm)
    n_row_tiles = n_pad // tm

    # Zero padding preserves semantics: padded cols of H stay exactly 0 (W rows/
    # cols and b are zero-padded); padded rows of H never reach real rows because
    # the corresponding A_hat columns are zero.  H is kept in bf16 between layers;
    # rounding compounds with depth (fine at 2-4 layers, widen to f32 if needed).
    feat_p = jnp.zeros((n_pad, f_pad), jnp.bfloat16).at[:n, :in_dim].set(
        features.astype(jnp.bfloat16))
    a_p = jnp.zeros((n_pad, n_pad), jnp.bfloat16).at[:n, :n].set(
        a_hat.astype(jnp.bfloat16))
    w_stack = jnp.zeros((n_layers, f_pad, f_pad), jnp.bfloat16)
    b_stack = jnp.zeros((n_layers, 1, f_pad), jnp.float32)
    for i, (w, b) in enumerate(params):
        fi, fo = w.shape
        w_stack = w_stack.at[i, :fi, :fo].set(w.astype(jnp.bfloat16))
        b_stack = b_stack.at[i, 0, :fo].set(b.astype(jnp.float32))

    # --- per-core VMEM budget and A-residency decision --------------------------
    vmem_cap = _vmem_capacity_bytes()
    base_bytes = (2 * n_pad * f_pad * 2        # H ping-pong scratch (bf16)
                  + 2 * f_pad * f_pad * 2      # W block, double buffered (bf16)
                  + 2 * f_pad * 4              # b block, double buffered (f32)
                  + 2 * tm * out_pad * 4)      # out tile, double buffered (f32)
    a_resident_bytes = n_pad * n_pad * 2       # whole A_hat resident (bf16)
    a_stream_bytes = 2 * tm * n_pad * 2        # streamed A row tile, double buffered
    a_resident = base_bytes + a_resident_bytes <= vmem_cap - (8 << 20)

    needed = base_bytes + (a_resident_bytes if a_resident else a_stream_bytes)
    vmem_limit = int(min(vmem_cap, needed + (8 << 20)))
    vmem_limit = max(vmem_limit, min(vmem_cap, 32 << 20))

    in_specs = [
        pl.BlockSpec((1, f_pad, f_pad), lambda l, r: (l, 0, 0)),   # W_l
        pl.BlockSpec((1, 1, f_pad), lambda l, r: (l, 0, 0)),       # b_l
        pl.BlockSpec(memory_space=pl.ANY),                         # features (HBM)
    ]
    scratch_shapes = [pltpu.VMEM((2, n_pad, f_pad), jnp.bfloat16)]  # H ping-pong
    if a_resident:
        in_specs.append(pl.BlockSpec(memory_space=pl.ANY))          # A_hat -> VMEM once
        scratch_shapes.append(pltpu.VMEM((n_pad, n_pad), jnp.bfloat16))
    else:
        in_specs.append(pl.BlockSpec((tm, n_pad), lambda l, r: (r, 0)))  # streamed A rows
    scratch_shapes.append(pltpu.SemaphoreType.DMA((2,)))

    n_last = n_layers - 1
    # Revisit trick: intermediate layers alias output block 0 and never write it,
    # so only the last layer's tiles are flushed to HBM.
    out_specs = pl.BlockSpec(
        (tm, out_pad), lambda l, r: ((l == n_last).astype(jnp.int32) * r, 0))

    kernel = functools.partial(_gcn_fused_kernel, n_layers=n_layers, tm=tm,
                               out_pad=out_pad, a_resident=a_resident)
    out_p = pl.pallas_call(
        kernel,
        out_shape=jax.ShapeDtypeStruct((n_pad, out_pad), jnp.float32),
        grid_spec=pltpu.PrefetchScalarGridSpec(
            num_scalar_prefetch=0,
            grid=(n_layers, n_row_tiles),
            in_specs=in_specs,
            out_specs=out_specs,
            scratch_shapes=scratch_shapes,
        ),
        # Layer l+1 reads every H row tile written at layer l through the VMEM
        # scratch, so both grid axes must stay sequential (no cross-core split).
        compiler_params=pltpu.CompilerParams(
            dimension_semantics=("arbitrary", "arbitrary"),
            vmem_limit_bytes=vmem_limit,
        ),
    )(w_stack, b_stack, feat_p, a_p)

    return out_p[:n, :out_dim]


def build_normalized_adjacency(key, n_nodes, p_edge=0.3):
    """Random symmetric graph with self loops, sym-normalized (norm='both')."""
    mask = (jax.random.uniform(key, (n_nodes, n_nodes)) < p_edge).astype(jnp.float32)
    a = jnp.maximum(mask, mask.T)
    a = jnp.maximum(a, jnp.eye(n_nodes, dtype=jnp.float32))  # self loops
    deg = jnp.sum(a, axis=1)
    d_inv_sqrt = 1.0 / jnp.sqrt(deg)
    return a * d_inv_sqrt[:, None] * d_inv_sqrt[None, :]


def init_params(key, in_dim, hid_dim, out_dim, n_layers):
    """Xavier-uniform weights, zero biases (matches DGL GraphConv reset_parameters)."""
    dims = [in_dim] + [hid_dim] * n_layers + [out_dim]
    params = []
    for i in range(len(dims) - 1):
        key, sub = jax.random.split(key)
        fan_in, fan_out = dims[i], dims[i + 1]
        limit = jnp.sqrt(6.0 / (fan_in + fan_out))
        w = jax.random.uniform(sub, (fan_in, fan_out), jnp.float32, -limit, limit)
        b = jnp.zeros((fan_out,), jnp.float32)
        params.append((w, b))
    return params


if __name__ == "__main__":
    # small, deterministic example (200 nodes pads to one or two row tiles)
    N_NODES = 200
    IN_DIM = 8
    HID_DIM = 32
    OUT_DIM = 4
    N_LAYERS = 2  # -> 3 GraphConv layers total

    key = jax.random.PRNGKey(0)
    k_graph, k_feat, k_param = jax.random.split(key, 3)

    a_hat = build_normalized_adjacency(k_graph, N_NODES)
    features = jax.random.normal(k_feat, (N_NODES, IN_DIM), jnp.float32)
    params = init_params(k_param, IN_DIM, HID_DIM, OUT_DIM, N_LAYERS)

    out = gcn_forward(a_hat, features, params)
    out = jax.block_until_ready(out)

    assert out.shape == (N_NODES, OUT_DIM), out.shape
    assert bool(jnp.all(jnp.isfinite(out)))

    # plain-JAX f32 reference; kernel uses bf16 MXU inputs -> loose tolerance
    h_ref = features
    for i, (w, b) in enumerate(params):
        z = a_hat @ (h_ref @ w) + b
        h_ref = jnp.maximum(z, 0.0) if i != len(params) - 1 else z
    max_abs_err = float(jnp.max(jnp.abs(out - h_ref)))
    assert jnp.allclose(out, h_ref, atol=5e-2, rtol=5e-2), max_abs_err

    print("KERNEL_OK")
</pallas_src>

<mosaic_0001>
module attributes {stable_mosaic.version = 11 : i64} {
  func.func @_gcn_fused_kernel(%arg0: i32, %arg1: i32, %arg2: memref<1x128x128xbf16, #tpu.memory_space<vmem>>, %arg3: memref<1x1x128xf32, #tpu.memory_space<vmem>>, %arg4: memref<256x128xbf16, #tpu.memory_space<any>>, %arg5: memref<256x256xbf16, #tpu.memory_space<any>>, %arg6: memref<256x128xf32, #tpu.memory_space<vmem>>, %arg7: memref<2x256x128xbf16, #tpu.memory_space<vmem>>, %arg8: memref<256x256xbf16, #tpu.memory_space<vmem>>, %arg9: memref<2x!tpu.dma_semaphore, #tpu.memory_space<semaphore_mem>>) attributes {dimension_semantics = [#tpu.dimension_semantics<arbitrary>, #tpu.dimension_semantics<arbitrary>], iteration_bounds = array<i64: 3, 1>, scalar_prefetch = 0 : i64, scratch_operands = 3 : i64, tpu.core_type = #tpu.core_type<tc>, window_params = [{transform_indices = @transform_0, window_bounds = array<i64: 1, 128, 128>}, {transform_indices = @transform_1, window_bounds = array<i64: 1, 1, 128>}, {}, {}, {transform_indices = @transform_4, window_bounds = array<i64: 256, 128>}]} {
    %c2_i32 = arith.constant 2 : i32
    %c0_i32 = arith.constant 0 : i32
    %0 = arith.cmpi eq, %c2_i32, %c0_i32 : i32
    %c1_i32 = arith.constant 1 : i32
    %1 = arith.select %0, %c1_i32, %c2_i32 : i32
    %2 = arith.remsi %arg0, %1 : i32
    %c0_i32_0 = arith.constant 0 : i32
    %3 = arith.cmpi ne, %2, %c0_i32_0 : i32
    %c0_i32_1 = arith.constant 0 : i32
    %4 = arith.cmpi slt, %2, %c0_i32_1 : i32
    %c0_i32_2 = arith.constant 0 : i32
    %5 = arith.cmpi slt, %1, %c0_i32_2 : i32
    %6 = arith.xori %4, %5 : i1
    %7 = arith.andi %6, %3 : i1
    %8 = arith.addi %2, %1 : i32
    %9 = arith.select %7, %8, %2 : i32
    %c1_i32_3 = arith.constant 1 : i32
    %10 = arith.subi %c1_i32_3, %9 : i32
    %c2_i32_4 = arith.constant 2 : i32
    %11 = arith.cmpi eq, %arg0, %c2_i32_4 : i32
    %c0_i32_5 = arith.constant 0 : i32
    %12 = arith.cmpi eq, %arg0, %c0_i32_5 : i32
    %c0_i32_6 = arith.constant 0 : i32
    %13 = arith.cmpi eq, %arg1, %c0_i32_6 : i32
    %14 = arith.andi %12, %13 : i1
    %15 = arith.extui %14 : i1 to i32
    %c0_i32_7 = arith.constant 0 : i32
    %16 = arith.cmpi ne, %15, %c0_i32_7 : i32
    scf.if %16 {
      %c1_i32_19 = arith.constant 1 : i32
      %c0_i32_20 = arith.constant 0 : i32
      %c0_i32_21 = arith.constant 0 : i32
      %c0_i32_22 = arith.constant 0 : i32
      %38 = tpu.memref_slice %arg7[%c1_i32_19, %c0_i32_21, %c0_i32_22] : memref<2x256x128xbf16, #tpu.memory_space<vmem>> -> memref<1x256x128xbf16, #tpu.memory_space<vmem>>
      %39 = tpu.memref_squeeze %38 : memref<1x256x128xbf16, #tpu.memory_space<vmem>> -> memref<256x128xbf16, #tpu.memory_space<vmem>>
      %40 = tpu.memref_slice %arg9[%c0_i32_20] : memref<2x!tpu.dma_semaphore, #tpu.memory_space<semaphore_mem>> -> memref<1x!tpu.dma_semaphore, #tpu.memory_space<semaphore_mem>>
      %41 = tpu.memref_squeeze %40 : memref<1x!tpu.dma_semaphore, #tpu.memory_space<semaphore_mem>> -> memref<!tpu.dma_semaphore, #tpu.memory_space<semaphore_mem>>
      tpu.enqueue_dma source(%arg4 : memref<256x128xbf16, #tpu.memory_space<any>>) target(%39 : memref<256x128xbf16, #tpu.memory_space<vmem>>) target_semaphore(%41 : memref<!tpu.dma_semaphore, #tpu.memory_space<semaphore_mem>>)
      %c1_i32_23 = arith.constant 1 : i32
      %42 = tpu.memref_slice %arg9[%c1_i32_23] : memref<2x!tpu.dma_semaphore, #tpu.memory_space<semaphore_mem>> -> memref<1x!tpu.dma_semaphore, #tpu.memory_space<semaphore_mem>>
      %43 = tpu.memref_squeeze %42 : memref<1x!tpu.dma_semaphore, #tpu.memory_space<semaphore_mem>> -> memref<!tpu.dma_semaphore, #tpu.memory_space<semaphore_mem>>
      tpu.enqueue_dma source(%arg5 : memref<256x256xbf16, #tpu.memory_space<any>>) target(%arg8 : memref<256x256xbf16, #tpu.memory_space<vmem>>) target_semaphore(%43 : memref<!tpu.dma_semaphore, #tpu.memory_space<semaphore_mem>>)
      %c1_i32_24 = arith.constant 1 : i32
      %44 = tpu.memref_slice %arg9[%c1_i32_24] : memref<2x!tpu.dma_semaphore, #tpu.memory_space<semaphore_mem>> -> memref<1x!tpu.dma_semaphore, #tpu.memory_space<semaphore_mem>>
      %45 = tpu.memref_squeeze %44 : memref<1x!tpu.dma_semaphore, #tpu.memory_space<semaphore_mem>> -> memref<!tpu.dma_semaphore, #tpu.memory_space<semaphore_mem>>
      tpu.wait_dma2 semaphore(%45 : memref<!tpu.dma_semaphore, #tpu.memory_space<semaphore_mem>>) src(%arg5 : memref<256x256xbf16, #tpu.memory_space<any>>) dst(%arg8 : memref<256x256xbf16, #tpu.memory_space<vmem>>)
      %c1_i32_25 = arith.constant 1 : i32
      %c0_i32_26 = arith.constant 0 : i32
      %c0_i32_27 = arith.constant 0 : i32
      %c0_i32_28 = arith.constant 0 : i32
      %46 = tpu.memref_slice %arg7[%c1_i32_25, %c0_i32_27, %c0_i32_28] : memref<2x256x128xbf16, #tpu.memory_space<vmem>> -> memref<1x256x128xbf16, #tpu.memory_space<vmem>>
      %47 = tpu.memref_squeeze %46 : memref<1x256x128xbf16, #tpu.memory_space<vmem>> -> memref<256x128xbf16, #tpu.memory_space<vmem>>
      %48 = tpu.memref_slice %arg9[%c0_i32_26] : memref<2x!tpu.dma_semaphore, #tpu.memory_space<semaphore_mem>> -> memref<1x!tpu.dma_semaphore, #tpu.memory_space<semaphore_mem>>
      %49 = tpu.memref_squeeze %48 : memref<1x!tpu.dma_semaphore, #tpu.memory_space<semaphore_mem>> -> memref<!tpu.dma_semaphore, #tpu.memory_space<semaphore_mem>>
      tpu.wait_dma2 semaphore(%49 : memref<!tpu.dma_semaphore, #tpu.memory_space<semaphore_mem>>) src(%arg4 : memref<256x128xbf16, #tpu.memory_space<any>>) dst(%47 : memref<256x128xbf16, #tpu.memory_space<vmem>>)
    } else {
    }
    %c256_i32 = arith.constant 256 : i32
    %17 = arith.muli %arg1, %c256_i32 : i32
    %18 = tpu.assume_multiple %17, 256 : i32
    %19 = arith.index_cast %18 : i32 to index
    %c0 = arith.constant 0 : index
    %20 = vector.load %arg8[%19, %c0] : memref<256x256xbf16, #tpu.memory_space<vmem>>, vector<256x256xbf16>
    %21 = arith.index_cast %10 : i32 to index
    %c0_8 = arith.constant 0 : index
    %c0_9 = arith.constant 0 : index
    %22 = vector.load %arg7[%21, %c0_8, %c0_9] : memref<2x256x128xbf16, #tpu.memory_space<vmem>>, vector<1x256x128xbf16>
    %23 = vector.shape_cast %22 : vector<1x256x128xbf16> to vector<256x128xbf16>
    %c0_10 = arith.constant 0 : index
    %c0_11 = arith.constant 0 : index
    %c0_12 = arith.constant 0 : index
    %24 = vector.load %arg2[%c0_10, %c0_11, %c0_12] : memref<1x128x128xbf16, #tpu.memory_space<vmem>>, vector<1x128x128xbf16>
    %25 = vector.shape_cast %24 : vector<1x128x128xbf16> to vector<128x128xbf16>
    %c0_13 = arith.constant 0 : index
    %c0_14 = arith.constant 0 : index
    %c0_15 = arith.constant 0 : index
    %26 = vector.load %arg3[%c0_13, %c0_14, %c0_15] : memref<1x1x128xf32, #tpu.memory_space<vmem>>, vector<1x1x128xf32>
    %27 = vector.shape_cast %26 : vector<1x1x128xf32> to vector<1x128xf32>
    %cst = arith.constant dense<0.000000e+00> : vector<256x128xf32>
    %28 = tpu.matmul %20, %23, %cst {dimension_numbers = #tpu.dot_dimension_numbers<[1], [0], [0], [1], [0, 0, 1, 1], [], []>} : vector<256x256xbf16>, vector<256x128xbf16>, vector<256x128xf32> -> vector<256x128xf32>
    %29 = arith.truncf %28 : vector<256x128xf32> to vector<256x128xbf16>
    %cst_16 = arith.constant dense<0.000000e+00> : vector<256x128xf32>
    %30 = tpu.matmul %29, %25, %cst_16 {dimension_numbers = #tpu.dot_dimension_numbers<[1], [0], [0], [1], [0, 0, 1, 1], [], []>} : vector<256x128xbf16>, vector<128x128xbf16>, vector<256x128xf32> -> vector<256x128xf32>
    %31 = vector.broadcast %27 : vector<1x128xf32> to vector<256x128xf32>
    %32 = arith.addf %30, %31 : vector<256x128xf32>
    %true = arith.constant true
    %33 = arith.xori %11, %true : i1
    %34 = arith.extui %33 : i1 to i32
    %c0_i32_17 = arith.constant 0 : i32
    %35 = arith.cmpi ne, %34, %c0_i32_17 : i32
    scf.if %35 {
      %cst_19 = arith.constant 0.000000e+00 : f32
      %38 = vector.broadcast %cst_19 : f32 to vector<256x128xf32>
      %39 = arith.maximumf %32, %38 : vector<256x128xf32>
      %40 = arith.truncf %39 : vector<256x128xf32> to vector<256x128xbf16>
      %41 = arith.index_cast %9 : i32 to index
      %42 = arith.index_cast %18 : i32 to index
      %c0_20 = arith.constant 0 : index
      %43 = vector.load %arg7[%41, %42, %c0_20] : memref<2x256x128xbf16, #tpu.memory_space<vmem>>, vector<1x256x128xbf16>
      %44 = vector.shape_cast %43 : vector<1x256x128xbf16> to vector<256x128xbf16>
      %45 = vector.shape_cast %40 : vector<256x128xbf16> to vector<1x256x128xbf16>
      tpu.vector_store %arg7[%41, %42, %c0_20], %45 {strides = array<i32>} : memref<2x256x128xbf16, #tpu.memory_space<vmem>>, vector<1x256x128xbf16>,
    } else {
    }
    %36 = arith.extui %11 : i1 to i32
    %c0_i32_18 = arith.constant 0 : i32
    %37 = arith.cmpi ne, %36, %c0_i32_18 : i32
    scf.if %37 {
      %c0_19 = arith.constant 0 : index
      %c0_20 = arith.constant 0 : index
      %38 = vector.load %arg6[%c0_19, %c0_20] : memref<256x128xf32, #tpu.memory_space<vmem>>, vector<256x128xf32>
      tpu.vector_store %arg6[%c0_19, %c0_20], %32 {strides = array<i32>} : memref<256x128xf32, #tpu.memory_space<vmem>>, vector<256x128xf32>,
    } else {
    }
    return
  }
  func.func @transform_0(%arg0: i32, %arg1: i32) -> (i32, i32, i32) {
    %c0_i32 = arith.constant 0 : i32
    %c0_i32_0 = arith.constant 0 : i32
    %c0_i32_1 = arith.constant 0 : i32
    return %arg0, %c0_i32, %c0_i32_0 : i32, i32, i32
  }
  func.func @transform_1(%arg0: i32, %arg1: i32) -> (i32, i32, i32) {
    %c0_i32 = arith.constant 0 : i32
    %c0_i32_0 = arith.constant 0 : i32
    %c0_i32_1 = arith.constant 0 : i32
    return %arg0, %c0_i32, %c0_i32_0 : i32, i32, i32
  }
  func.func @transform_4(%arg0: i32, %arg1: i32) -> (i32, i32) {
    %c2_i32 = arith.constant 2 : i32
    %0 = arith.cmpi eq, %arg0, %c2_i32 : i32
    %1 = arith.extui %0 : i1 to i32
    %2 = arith.muli %1, %arg1 : i32
    %c0_i32 = arith.constant 0 : i32
    %c0_i32_0 = arith.constant 0 : i32
    return %2, %c0_i32 : i32, i32
  }
}

</mosaic_0001>

<bundles_post_ra>
// kernel: tpu_custom_call.1
= control target key start
LH: loop header
LB: loop body
LE: loop exit
PB: predicated region body
PF: predicated region fallthrough
CT: control target
= control target key end

     0   :  { %9 = vsyncpa [#allocation6], 0  ;;  %s1982_s0 = inlined_call_operand.hbm [shape: bf16[3,128,128], index: 0, kind: input, shape index: {}]   ;;  %s1983_s1 = inlined_call_operand.vmem [shape: f32[3,1,128], index: 1, kind: input, shape index: {}]   ;;  %s1984_s2 = inlined_call_operand.hbm [shape: bf16[256,128], index: 2, kind: input, shape index: {}]   ;;  %s1985_s3 = inlined_call_operand.hbm [shape: bf16[256,256], index: 3, kind: input, shape index: {}]   ;;  %s1986_s4 = inlined_call_operand.hbm [shape: f32[256,128], index: 4, kind: output, shape index: {}]  }
   0x1   :  { %11 = vsyncpa [#allocation6 + $0x1], 0 }
   0x2   :  { %12 = vsyncpa [#allocation7], 0 }
   0x3   :  { %14 = vsyncpa [#allocation7 + $0x1], 0  ;;  %s1506_s15 = smov 0   ;;  %s1508_s16 = smov 0  }
   0x4   :  { %s1510_s17 = smov 0   ;;  %s1512_s18 = smov 0  }
   0x5   :  { %s1514_s19 = smov 0   ;;  %s1516_s20 = smov 0  }
   0x6 LB: > { %s977_s21 = sadd.s32 4294967295, %s1463_s20   ;;  %s978_s22 = sadd.s32 4294967294, %s1463_s20   ;;  %s1463_s20 = sphi %s1516_s20, %s20_s20   ;;  %s1459_s19 = sphi %s1514_s19, %s1996_s19   ;;  %s1455_s18 = sphi %s1512_s18, %s1995_s18   ;;  %s1451_s17 = sphi %s1510_s17, %s1994_s17   ;;  %s1447_s16 = sphi %s1508_s16, %s1993_s16   ;;  %s1443_s15 = sphi %s1506_s15, %s1992_s15  }
   0x7   : > { %s32_s23 = sadd.s32 1, %s1459_s19  ;;  %s39_s24 = sadd.s32 1, %s1451_s17 }
   0x8   : > { %p34_p0 = scmp.ge.s32.totalorder %s32_s23, 3  ;;  %p46_p1 = scmp.ne.s32.totalorder %s1451_s17, %s1447_s16 }
   0x9   : > { %p47_p2 = scmp.eq.s32.totalorder %s1463_s20, 0  ;;  %p52_p3 = scmp.ne.s32.totalorder %s1447_s16, %s1443_s15 }
   0xa   : > { %s1998_s23 = smov (%p34_p0, %s32_s23), 0  ;;  %p53_p5 = scmp.eq.s32.totalorder %s977_s21, 0 }
   0xb   : > { %p1544_p4 = por %p47_p2, %p46_p1  ;;  %s36_s26 = ssub.s32 %s1459_s19, %s1998_s23 }
   0xc   : > { %p37_p6 = scmp.eq.s32.totalorder %s36_s26, 0  ;;  %p1552_p7 = por %p53_p5, %p52_p3 }
   0xd   : > { %p1245_p8 = scmp.lt.s32.totalorder %s1463_s20, 3  ;;  %s134_s28 = sand.u32 1, %s1451_s17  }
   0xe   : > { %s1559_s29 = scalar_select %p37_p6, %s1451_s17, %s39_s24  }
   0xf   : > { %s981_s30 = sshll.u32 %s134_s28, 6  ;;  %s1013_s5 = sshll.u32 %s1459_s19, 10 }
  0x10   : > { %s1565_s8 = scalar_lea.hbm %s1982_s0, %s1013_s5  ;;  %s138_s9 = scalar_lea.vmem [#allocation5], %s981_s30 }
  0x11   : > { %s145_s10 = sshll.u32 %s138_s9, 4  ;;  %p1571_p9 = pnand %p1245_p8, %p1544_p4  ;;  %s1567_s10 = int_to_ptr.vmem [resolvable:$true] %s145_s10 }
  0x12   : > { %s1576_s12 = scalar_lea.sflag [#allocation6], %s134_s28  ;;  %s1319_s13 = scalar_lea.hbm %s1565_s8, 1024 }
  0x13   : > { %p1320_p11 = scmp.ne.s32.totalorder %s1565_s8, %s1319_s13  ;;  %p1321_p12 = pneg %p1571_p9 }
  0x14   : > { %s1324_s24 = scalar_lea.hbm %s1982_s0, 3072  ;;  %p1325_p1 = scmp.lt.u32.totalorder %s1565_s8, %s1982_s0 }
  0x15   : > { %p1322_p13 = pnand %p1321_p12, %p1320_p11  ;;  %p1326_p2 = scmp.lt.u32.totalorder %s1324_s24, %s1319_s13 }
  0x16   : > { %p1328_p4 = scmp.lt.u32.totalorder %s1319_s13, %s1565_s8 }
  0x17   : > { %p1323_p0 = pneg %p1322_p13  ;;  %p1327_p3 = por %p1326_p2, %p1325_p1 }
  0x19   : > { %p1329_p5 = por %p1328_p4, %p1327_p3 }
  0x1b   : > { %p1330_p6 = pnand %p1329_p5, %p1323_p0 }
  0x1d   : > { %1333 = shalt.err (!%p1330_p6)
}
  0x1e   : > { %s1334_s28 = scalar_lea.vmem %s1567_s10, 1024  ;;  %s1465_s30 = smov [#allocation5]  }
  0x1f   : > { %p1335_p8 = scmp.ne.s32.totalorder %s1567_s10, %s1334_s28  ;;  %s1339_s5 = sshll.u32 %s1465_s30, 4  ;;  %s1340_s5 = int_to_ptr.vmem [resolvable:$false] %s1339_s5 }
  0x20   : > { %s1341_s6 = scalar_lea.vmem %s1340_s5, 2048  ;;  %p1342_p10 = scmp.lt.s32.totalorder %s1567_s10, %s1340_s5 }
  0x21   : > { %p1337_p11 = pnand %p1335_p8, %p1321_p12  ;;  %p1343_p1 = scmp.lt.s32.totalorder %s1341_s6, %s1334_s28 }
  0x23   : > { %p1338_p13 = pneg %p1337_p11  ;;  %p1344_p2 = por %p1343_p1, %p1342_p10 }
  0x25   : > { %p1345_p3 = pnand %p1344_p2, %p1338_p13 }
  0x27   : > { %1348 = shalt.err (!%p1345_p3)
}
  0x28   : > { %s1466_s7 = smov 64   ;;  %s1467_s9 = smov 4  }
  0x29   : > { %1240 = dma.hbm_to_vmem [thread:$0]  (!%p1571_p9), %s1565_s8, 1024, %s1567_s10, %s1576_s12, %s1466_s7, %s1466_s7, %s1467_s9  }
  0x2a   : > { %p159_p12 = scmp.lt.s32.totalorder %s1463_s20, 4  ;;  %p1990_p0 = scmp.ge.s32.totalorder %s1463_s20, 1 }
  0x2c   : > { %p160_p4 = pnand %p1990_p0, %p159_p12 }
  0x2d   : > { %s165_s13 = sand.u32 (!%p160_p4), 1, %s1447_s16  }
  0x2e   : > { %163 = sbr.rel (%p160_p4) target bundleno = 727 (0x2d7), region = 28  ;;  %s985_s14 = sshll.u32 (!%p160_p4), %s165_s13, 6 }
  0x2f   : > { %s166_s15 = scalar_lea.sflag (!%p160_p4), [#allocation6], %s165_s13  ;;  %s1608_s24 = scalar_lea.vmem (!%p160_p4), [#allocation5], %s985_s14 }
  0x35   : > { %1426 = dma.done.wait (%p1552_p7), %s166_s15, 1024  }
  0x36   : > { %1428 = vsyncadd (%p1552_p7), %s166_s15, 4294966272  ;;  %p193_p9 = scmp.lt.s32.totalorder %s1455_s18, 2  ;;  %p201_p10 = scmp.lt.s32.totalorder %s1455_s18, 0 }
  0x37   : > { %s202_s8 = ssub.s32 0, %s1455_s18  ;;  %p215_p5 = scmp.eq.s32.totalorder %s1455_s18, 0 }
  0x38   : > { %s1619_s10 = scalar_select %p193_p9, %s1455_s18, 2 }
  0x39   : > { %s986_s11 = smin.u32 %s1455_s18, %s202_s8 }
  0x3a   : > { %s195_s26 = scalar_lea.vmem %s1983_s1, %s1619_s10  ;;  %s204_s27 = sand.u32 1, %s986_s11  }
  0x3b   : > { %s205_s28 = ssub.s32 0, %s204_s27 }
  0x3c   : > { %s2000_s28 = smov (!%p201_p10, %s205_s28), %s204_s27 }
  0x3d   : > { %p988_p7 = scmp.lt.s32.totalorder %s2000_s28, 0  ;;  %s211_s30 = sadd.s32 2, %s2000_s28 }
  0x3f   : > { %s2002_s30 = smov (!%p988_p7, %s211_s30), %s2000_s28 }
  0x40   : > { %s213_s5 = ssub.s32 1, %s2002_s30 }
  0x41   : > { %s1468_s6 = smov [#allocation2 + $0x80]   ;;  %s1469_s9 = smov [#allocation3]  }
  0x42   : > { %s229_s7 = sshll.u32 %s1468_s6, 4  ;;  %s1629_s13 = sshll.u32 %s1469_s9, 4  ;;  %s230_s7 = int_to_ptr.vmem [resolvable:$true] %s229_s7  ;;  %s247_s13 = int_to_ptr.vmem [resolvable:$true] %s1629_s13 }
  0x43   : > { %s1349_s8 = scalar_lea.hbm %s1984_s2, 2048 }
  0x44   : > { %p1350_p6 = scmp.ne.s32.totalorder %s1984_s2, %s1349_s8  ;;  %p1355_p13 = scmp.lt.u32.totalorder %s1349_s8, %s1984_s2 }
  0x46   : > { %p1351_p8 = pnand %p1350_p6, %p215_p5 }
  0x48   : > { %p1352_p11 = pneg %p1351_p8 }
  0x4a   : > { %p1357_p1 = pnand %p1355_p13, %p1352_p11 }
  0x4c   : > { %1360 = shalt.err (!%p1357_p1)  }
  0x4d   : > { %s1361_s28 = scalar_lea.vmem %s230_s7, 2048  ;;  %s1470_s6 = smov [#allocation2]  }
  0x4e   : > { %p1362_p2 = scmp.ne.s32.totalorder %s230_s7, %s1361_s28  ;;  %s1365_s9 = sshll.u32 %s1470_s6, 4  ;;  %s1366_s9 = int_to_ptr.vmem [resolvable:$false] %s1365_s9 }
  0x4f   : > { %s1367_s14 = scalar_lea.vmem %s1366_s9, 4096  ;;  %p1368_p0 = scmp.lt.s32.totalorder %s230_s7, %s1366_s9 }
  0x50   : > { %p1363_p3 = pnand %p1362_p2, %p215_p5  ;;  %p1369_p4 = scmp.lt.s32.totalorder %s1367_s14, %s1361_s28 }
  0x52   : > { %p1364_p12 = pneg %p1363_p3  ;;  %p1370_p9 = por %p1369_p4, %p1368_p0 }
  0x54   : > { %p1371_p10 = pnand %p1370_p9, %p1364_p12 }
  0x56   : > { %1374 = shalt.err (!%p1371_p10)  }
  0x57   : > { %1219 = dma.hbm_to_vmem [thread:$0]  (%p215_p5), %s1984_s2, 2048, %s230_s7, [#allocation4] }
  0x58   : > { %s1220_s11 = scalar_select %p215_p5, [#allocation0], [#allocation15] }
  0x59   : > { %s1471_s25 = smov 256   ;;  %s1472_s27 = smov 2  }
  0x5a   : > { %s238_s12 = sld [smem:[%s1220_s11]]   ;;  %s1473_s28 = smov 64  }
  0x5b   : > { %1221 = sst [smem:[#allocation14]] (%p215_p5), %s1471_s25  ;;  %s1474_s7 = smov 128  }
  0x5c   : > { %1222 = sst [smem:[#allocation14 + $0x1]] (%p215_p5), %s1471_s25  ;;  %s1475_s14 = smov 4  }
  0x5d   : > { %1223 = sst [smem:[#allocation14 + $0x2]] (%p215_p5), %s1472_s27  ;;  %s1476_s15 = smov [#allocation4 + $0x1]  }
  0x5e   : > { %1224 = sst [smem:[#allocation14 + $0x3]] (%p215_p5), %s1473_s28  ;;  %s1477_s8 = smov [#allocation13]  }
  0x5f   : > { %1225 = sst [smem:[#allocation14 + $0x4]] (%p215_p5), %s1474_s7 }
  0x60   : > { %1226 = sst [smem:[#allocation14 + $0x5]] (%p215_p5), %s1472_s27  ;;  %s990_s6 = sshll.u32 %s238_s12, 26 }
  0x61   : > { %1227 = sst [smem:[#allocation14 + $0x6]] (%p215_p5), %s1474_s7  ;;  %s991_s9 = sadd.s32 134217728, %s990_s6 }
  0x62   : > { %1228 = sst [smem:[#allocation14 + $0x7]] (%p215_p5), %s1473_s28 }
  0x63   : > { %1229 = sst [smem:[#allocation14 + $0x8]] (%p215_p5), %s1475_s14 }
  0x64   : > { %1230 = dma.general (%p215_p5), %s1985_s3, 4096, %s247_s13, %s1476_s15, %s1477_s8, [#allocation14], %s991_s9, 0  }
  0x65   : > { %1430 = dma.done.wait (%p215_p5), [#allocation4 + $0x1], 4096 }
  0x66   : > { %1432 = vsyncadd (%p215_p5), [#allocation4 + $0x1], 4294963200 }
  0x67   : > { %1434 = dma.done.wait (%p215_p5), [#allocation4], 2048 }
  0x68   : > { %1436 = vsyncadd (%p215_p5), [#allocation4], 4294965248  ;;  %s1015_s12 = sshll.u32 %s213_s5, 7  ;;  %v283_v0 = vld [vmem:[#allocation3 + $0x8] sm:$0xff]  ;;  %v1311_v18 = vld [vmem:[%s1608_s24] sm:$0xff]   ;;  %p1003_p5 = scmp.eq.s32.totalorder %s1455_s18, 2 }
  0x69   : > { %382 = vmatprep.mubr.bf16.mxu0 %v283_v0  ;;  %s1687_s27 = scalar_lea.vmem [#allocation2], %s1015_s12  ;;  %v307_v8 = vld [vmem:[#allocation3 + $0xc8] sm:$0xff]  ;;  %v282_v19 = vld [vmem:[#allocation3] sm:$0xff]  ;;  %v285_v21 = vld [vmem:[#allocation3 + $0x18] sm:$0xff]  ;;  %s1016_s10 = sshll.u32 (!%p1003_p5), %s2002_s30, 7 }
  0x6a   : > { %v325_v1 = vld [vmem:[%s1687_s27 + $0x40] sm:$0xff]  ;;  %v326_v3 = vld [vmem:[%s1687_s27 + $0x48] sm:$0xff]  ;;  %v327_v5 = vld [vmem:[%s1687_s27 + $0x50] sm:$0xff]  ;;  %478 = vmatprep.mubr.bf16.mxu1 %v307_v8 }
  0x6b   : > { %v317_v2 = vld [vmem:[%s1687_s27] sm:$0xff]  ;;  %1017 = vmatprep.subr.bf16.mxu0 %v325_v1  ;;  %1201 = vmatprep.subr.bf16.mxu1 %v325_v1  ;;  %v318_v4 = vld [vmem:[%s1687_s27 + $0x8] sm:$0xff]  ;;  %v319_v6 = vld [vmem:[%s1687_s27 + $0x10] sm:$0xff] }
  0x6c   : > { %1018 = vmatpush3.bf16.msra.mxu0 %v317_v2  ;;  %1209 = vmatpush3.bf16.msra.mxu1 %v317_v2  ;;  %v328_v7 = vld [vmem:[%s1687_s27 + $0x58] sm:$0xff]  ;;  %v329_v10 = vld [vmem:[%s1687_s27 + $0x60] sm:$0xff]  ;;  %v330_v12 = vld [vmem:[%s1687_s27 + $0x68] sm:$0xff] }
  0x6d   : > { %1019 = vmatprep.subr.bf16.mxu0 %v326_v3  ;;  %1202 = vmatprep.subr.bf16.mxu1 %v326_v3  ;;  %v320_v9 = vld [vmem:[%s1687_s27 + $0x18] sm:$0xff]  ;;  %v321_v11 = vld [vmem:[%s1687_s27 + $0x20] sm:$0xff]  ;;  %v322_v13 = vld [vmem:[%s1687_s27 + $0x28] sm:$0xff] }
  0x6e   : > { %v331_v14 = vld [vmem:[%s1687_s27 + $0x70] sm:$0xff]  ;;  %v332_v16 = vld [vmem:[%s1687_s27 + $0x78] sm:$0xff]  ;;  %v306_v20 = vld [vmem:[#allocation3 + $0xc0] sm:$0xff] }
  0x6f   : > { %v323_v15 = vld [vmem:[%s1687_s27 + $0x30] sm:$0xff]  ;;  %v324_v17 = vld [vmem:[%s1687_s27 + $0x38] sm:$0xff]  ;;  %v1312_v23 = vld [vmem:[%s1608_s24 + $0x8] sm:$0xff]  }
  0x70   : > { %1020 = vmatpush3.bf16.msra.mxu0 %v318_v4  ;;  %1210 = vmatpush3.bf16.msra.mxu1 %v318_v4  ;;  %v309_v22 = vld [vmem:[#allocation3 + $0xd8] sm:$0xff]  ;;  %v1313_v24 = vld [vmem:[%s1608_s24 + $0x10] sm:$0xff]   ;;  %v287_v27 = vld [vmem:[#allocation3 + $0x28] sm:$0xff] }
  0x71   : > { %1021 = vmatprep.subr.bf16.mxu0 %v327_v5  ;;  %1203 = vmatprep.subr.bf16.mxu1 %v327_v5  ;;  %v284_v25 = vld [vmem:[#allocation3 + $0x10] sm:$0xff]  ;;  %v311_v28 = vld [vmem:[#allocation3 + $0xe8] sm:$0xff]  ;;  %v1314_v29 = vld [vmem:[%s1608_s24 + $0x18] sm:$0xff]  }
  0x72   : > { %v308_v26 = vld [vmem:[#allocation3 + $0xd0] sm:$0xff]  ;;  %v286_v30 = vld [vmem:[#allocation3 + $0x20] sm:$0xff]  ;;  %v289_v32 = vld [vmem:[#allocation3 + $0x38] sm:$0xff] }
  0x73   : > { %v310_v31 = vld [vmem:[#allocation3 + $0xe0] sm:$0xff]  ;;  %v313_v33 = vld [vmem:[#allocation3 + $0xf8] sm:$0xff]  ;;  %v288_v34 = vld [vmem:[#allocation3 + $0x30] sm:$0xff] }
  0x74   : > { %1022 = vmatpush3.bf16.msra.mxu0 %v319_v6  ;;  %1211 = vmatpush3.bf16.msra.mxu1 %v319_v6  ;;  %v312_v35 = vld [vmem:[#allocation3 + $0xf0] sm:$0xff]  ;;  %v291_v36 = vld [vmem:[#allocation3 + $0x48] sm:$0xff]  ;;  %v290_v37 = vld [vmem:[#allocation3 + $0x40] sm:$0xff] }
  0x75   : > { %1023 = vmatprep.subr.bf16.mxu0 %v328_v7  ;;  %1204 = vmatprep.subr.bf16.mxu1 %v328_v7  ;;  %v293_v38 = vld [vmem:[#allocation3 + $0x58] sm:$0xff]  ;;  %v292_v39 = vld [vmem:[#allocation3 + $0x50] sm:$0xff]  ;;  %v295_v40 = vld [vmem:[#allocation3 + $0x68] sm:$0xff] }
  0x76   : > { %v294_v41 = vld [vmem:[#allocation3 + $0x60] sm:$0xff]  ;;  %v297_v42 = vld [vmem:[#allocation3 + $0x78] sm:$0xff]  ;;  %v296_v43 = vld [vmem:[#allocation3 + $0x70] sm:$0xff] }
  0x77   : > { %v299_v44 = vld [vmem:[#allocation3 + $0x88] sm:$0xff]  ;;  %v298_v45 = vld [vmem:[#allocation3 + $0x80] sm:$0xff]  ;;  %v301_v46 = vld [vmem:[#allocation3 + $0x98] sm:$0xff] }
  0x78   : > { %1024 = vmatpush3.bf16.msra.mxu0 %v320_v9  ;;  %1212 = vmatpush3.bf16.msra.mxu1 %v320_v9  ;;  %v300_v47 = vld [vmem:[#allocation3 + $0x90] sm:$0xff]  ;;  %v303_v48 = vld [vmem:[#allocation3 + $0xa8] sm:$0xff]  ;;  %v302_v49 = vld [vmem:[#allocation3 + $0xa0] sm:$0xff] }
  0x79   : > { %1025 = vmatprep.subr.bf16.mxu0 %v329_v10  ;;  %1205 = vmatprep.subr.bf16.mxu1 %v329_v10  ;;  %v305_v50 = vld [vmem:[#allocation3 + $0xb8] sm:$0xff]  ;;  %v1315_v51 = vld [vmem:[%s1608_s24 + $0x20] sm:$0xff]   ;;  %v304_v52 = vld [vmem:[#allocation3 + $0xb0] sm:$0xff] }
  0x7a   : > { %v1316_v53 = vld [vmem:[%s1608_s24 + $0x28] sm:$0xff]   ;;  %v1317_v54 = vld [vmem:[%s1608_s24 + $0x30] sm:$0xff]   ;;  %v1318_v55 = vld [vmem:[%s1608_s24 + $0x38] sm:$0xff]  }
  0x7c   : > { %1026 = vmatpush3.bf16.msra.mxu0 %v321_v11  ;;  %1213 = vmatpush3.bf16.msra.mxu1 %v321_v11 }
  0x7d   : > { %1027 = vmatprep.subr.bf16.mxu0 %v330_v12  ;;  %1206 = vmatprep.subr.bf16.mxu1 %v330_v12 }
  0x80   : > { %1028 = vmatpush3.bf16.msra.mxu0 %v322_v13  ;;  %1214 = vmatpush3.bf16.msra.mxu1 %v322_v13 }
  0x81   : > { %1029 = vmatprep.subr.bf16.mxu0 %v331_v14  ;;  %1207 = vmatprep.subr.bf16.mxu1 %v331_v14 }
  0x84   : > { %1030 = vmatpush3.bf16.msra.mxu0 %v323_v15  ;;  %1215 = vmatpush3.bf16.msra.mxu1 %v323_v15 }
  0x85   : > { %1031 = vmatprep.subr.bf16.mxu0 %v332_v16  ;;  %1208 = vmatprep.subr.bf16.mxu1 %v332_v16 }
  0x88   : > { %1032 = vmatpush3.bf16.msra.mxu0 %v324_v17  ;;  %1216 = vmatpush3.bf16.msra.mxu1 %v324_v17 }
  0x89   : > { %1153 = vmatprep.subr.bf16.mxu1 %v1311_v18 }
  0x8b   : > { %383 = vmatmul.mubr.bf16.vlgmr.msra.gmra.mrb[0].mxu0 %v282_v19  ;;  %479 = vmatmul.mubr.bf16.vlgmr.msra.gmra.mrb[0].mxu1 %v306_v20 }
  0x8c   : > { %390 = vmatprep.mubr.bf16.mxu0 %v285_v21  ;;  %486 = vmatprep.mubr.bf16.mxu1 %v309_v22 }
  0x8d   : > { %1154 = vmatpush3.bf16.msra.mxu1 %v1311_v18 }
  0x8e   : > { %1155 = vmatprep.subr.bf16.mxu1 %v1312_v23 }
  0x91   : > { %1156 = vmatpush3.bf16.msra.mxu1 %v1312_v23 }
  0x92   : > { %1157 = vmatprep.subr.bf16.mxu1 %v1313_v24 }
  0x93   : > { %391 = vmatmul.mubr.bf16.gmra.mrb[4].mxu0 %v284_v25  ;;  %487 = vmatmul.mubr.bf16.gmra.mrb[4].mxu1 %v308_v26 }
  0x94   : > { %398 = vmatprep.mubr.bf16.mxu0 %v287_v27  ;;  %494 = vmatprep.mubr.bf16.mxu1 %v311_v28 }
  0x95   : > { %1158 = vmatpush3.bf16.msra.mxu1 %v1313_v24 }
  0x96   : > { %1159 = vmatprep.subr.bf16.mxu1 %v1314_v29 }
  0x99   : > { %1160 = vmatpush3.bf16.msra.mxu1 %v1314_v29 }
  0x9a   : > { %1161 = vmatprep.subr.bf16.mxu1 %v1315_v51 }
  0x9b   : > { %399 = vmatmul.mubr.bf16.gmra.mrb[8].mxu0 %v286_v30  ;;  %495 = vmatmul.mubr.bf16.gmra.mrb[8].mxu1 %v310_v31 }
  0x9c   : > { %406 = vmatprep.mubr.bf16.mxu0 %v289_v32  ;;  %502 = vmatprep.mubr.bf16.mxu1 %v313_v33 }
  0x9d   : > { %1162 = vmatpush3.bf16.msra.mxu1 %v1315_v51 }
  0x9e   : > { %1163 = vmatprep.subr.bf16.mxu1 %v1316_v53 }
  0xa1   : > { %1164 = vmatpush3.bf16.msra.mxu1 %v1316_v53 }
  0xa2   : > { %1165 = vmatprep.subr.bf16.mxu1 %v1317_v54 }
  0xa3   : > { %407 = vmatmul.mubr.bf16.gmra.mrb[12].mxu0 %v288_v34  ;;  %503 = vmatmul.mubr.bf16.gmra.mrb[12].mxu1 %v312_v35 }
  0xa4   : > { %414 = vmatprep.mubr.bf16.mxu0 %v291_v36 }
  0xa5   : > { %1166 = vmatpush3.bf16.msra.mxu1 %v1317_v54 }
  0xa6   : > { %1167 = vmatprep.subr.bf16.mxu1 %v1318_v55 }
  0xa9   : > { %1168 = vmatpush3.bf16.msra.mxu1 %v1318_v55 }
  0xab   : > { %415 = vmatmul.mubr.bf16.gmra.mrb[16].mxu0 %v290_v37 }
  0xac   : > { %422 = vmatprep.mubr.bf16.mxu0 %v293_v38 }
  0xb3   : > { %423 = vmatmul.mubr.bf16.gmra.mrb[20].mxu0 %v292_v39 }
  0xb4   : > { %430 = vmatprep.mubr.bf16.mxu0 %v295_v40 }
  0xbb   : > { %431 = vmatmul.mubr.bf16.gmra.mrb[24].mxu0 %v294_v41 }
  0xbc   : > { %438 = vmatprep.mubr.bf16.mxu0 %v297_v42 }
  0xc3   : > { %439 = vmatmul.mubr.bf16.gmra.mrb[28].mxu0 %v296_v43 }
  0xc4   : > { %446 = vmatprep.mubr.bf16.mxu0 %v299_v44 }
  0xcb   : > { %447 = vmatmul.mubr.bf16.gmra.mrb[32].mxu0 %v298_v45 }
  0xcc   : > { %454 = vmatprep.mubr.bf16.mxu0 %v301_v46 }
  0xd3   : > { %455 = vmatmul.mubr.bf16.gmra.mrb[36].mxu0 %v300_v47 }
  0xd4   : > { %462 = vmatprep.mubr.bf16.mxu0 %v303_v48 }
  0xdb   : > { %463 = vmatmul.mubr.bf16.gmra.mrb[40].mxu0 %v302_v49 }
  0xdc   : > { %470 = vmatprep.mubr.bf16.mxu0 %v305_v50 }
  0xe3   : > { %471 = vmatmul.mubr.bf16.gmra.mrb[44].mxu0 %v304_v52 }
 0x15e   : > { %v1033_v56 = vpop.f32.mrb[0].mxu0  ;;  %v1105_v57 = vpop.f32.mrb[0].mxu1 }
 0x15f   : > { %v1034_v58 = vpop.f32.mrb[1].mxu0  ;;  %v1106_v59 = vpop.f32.mrb[1].mxu1 }
 0x160   : > { %v1035_v60 = vadd.f32 %v1034_v58, %v1033_v56  ;;  %v1036_v61 = vpop.f32.mrb[2].mxu0  ;;  %v1713_v62 = vadd.f32 %v1106_v59, %v1105_v57  ;;  %v1108_v63 = vpop.f32.mrb[2].mxu1 }
 0x161   : > { %v1037_v0 = vpop.f32.mrb[3].mxu0  ;;  %v1109_v1 = vpop.f32.mrb[3].mxu1 }
 0x162   : > { %v1038_v2 = vadd.f32 %v1037_v0, %v1036_v61  ;;  %v1715_v3 = vadd.f32 %v1109_v1, %v1108_v63 }
 0x164   : > { %v511_v4 = vpack.c.bf16 %v1038_v2, %v1035_v60  ;;  %v523_v5 = vpack.c.bf16 %v1715_v3, %v1713_v62 }
 0x166   : > { %v1039_v6 = vpop.f32.mrb[4].mxu0  ;;  %1169 = vmatprep.mubr.bf16.mxu1 %v511_v4  ;;  %v1111_v7 = vpop.f32.mrb[4].mxu1 }
 0x167   : > { %v1040_v8 = vpop.f32.mrb[5].mxu0  ;;  %v1112_v9 = vpop.f32.mrb[5].mxu1 }
 0x168   : > { %v1041_v10 = vadd.f32 %v1040_v8, %v1039_v6  ;;  %v1042_v11 = vpop.f32.mrb[6].mxu0  ;;  %v1719_v12 = vadd.f32 %v1112_v9, %v1111_v7  ;;  %v1114_v13 = vpop.f32.mrb[6].mxu1 }
 0x169   : > { %v1043_v14 = vpop.f32.mrb[7].mxu0  ;;  %v1115_v15 = vpop.f32.mrb[7].mxu1 }
 0x16a   : > { %v1044_v16 = vadd.f32 %v1043_v14, %v1042_v11  ;;  %v1721_v17 = vadd.f32 %v1115_v15, %v1114_v13 }
 0x16c   : > { %v512_v18 = vpack.c.bf16 %v1044_v16, %v1041_v10  ;;  %v524_v19 = vpack.c.bf16 %v1721_v17, %v1719_v12 }
 0x16e   : > { %v1045_v20 = vpop.f32.mrb[8].mxu0  ;;  %1170 = vmatmul.mubr.bf16.vlgmr.msra.gmra.mrb[16].mxu1 %v512_v18  ;;  %v1117_v21 = vpop.f32.mrb[8].mxu1 }
 0x16f   : > { %v1046_v22 = vpop.f32.mrb[9].mxu0  ;;  %v1118_v23 = vpop.f32.mrb[9].mxu1 }
 0x170   : > { %v1047_v24 = vadd.f32 %v1046_v22, %v1045_v20  ;;  %v1048_v25 = vpop.f32.mrb[10].mxu0  ;;  %v1725_v26 = vadd.f32 %v1118_v23, %v1117_v21  ;;  %v1120_v27 = vpop.f32.mrb[10].mxu1 }
 0x171   : > { %v1049_v28 = vpop.f32.mrb[11].mxu0  ;;  %v1121_v29 = vpop.f32.mrb[11].mxu1 }
 0x172   : > { %v1050_v30 = vadd.f32 %v1049_v28, %v1048_v25  ;;  %v1727_v31 = vadd.f32 %v1121_v29, %v1120_v27 }
 0x174   : > { %v513_v32 = vpack.c.bf16 %v1050_v30, %v1047_v24  ;;  %v525_v33 = vpack.c.bf16 %v1727_v31, %v1725_v26 }
 0x176   : > { %v1051_v34 = vpop.f32.mrb[12].mxu0  ;;  %1173 = vmatprep.mubr.bf16.mxu1 %v513_v32  ;;  %v1123_v35 = vpop.f32.mrb[12].mxu1 }
 0x177   : > { %v1052_v36 = vpop.f32.mrb[13].mxu0  ;;  %v1124_v37 = vpop.f32.mrb[13].mxu1 }
 0x178   : > { %v1053_v38 = vadd.f32 %v1052_v36, %v1051_v34  ;;  %v1054_v39 = vpop.f32.mrb[14].mxu0  ;;  %v1731_v40 = vadd.f32 %v1124_v37, %v1123_v35  ;;  %v1126_v41 = vpop.f32.mrb[14].mxu1 }
 0x179   : > { %v1055_v42 = vpop.f32.mrb[15].mxu0  ;;  %v1127_v43 = vpop.f32.mrb[15].mxu1 }
 0x17a   : > { %v1056_v44 = vadd.f32 %v1055_v42, %v1054_v39  ;;  %v1733_v45 = vadd.f32 %v1127_v43, %v1126_v41 }
 0x17c   : > { %v514_v46 = vpack.c.bf16 %v1056_v44, %v1053_v38  ;;  %v526_v47 = vpack.c.bf16 %v1733_v45, %v1731_v40 }
 0x17e   : > { %v1057_v48 = vpop.f32.mrb[16].mxu0  ;;  %1174 = vmatmul.mubr.bf16.gmra.mrb[20].mxu1 %v514_v46 }
 0x17f   : > { %v1058_v49 = vpop.f32.mrb[17].mxu0 }
 0x180   : > { %v1059_v50 = vadd.f32 %v1058_v49, %v1057_v48  ;;  %v1060_v51 = vpop.f32.mrb[18].mxu0 }
 0x181   : > { %v1061_v52 = vpop.f32.mrb[19].mxu0 }
 0x182   : > { %v1062_v53 = vadd.f32 %v1061_v52, %v1060_v51  ;;  %v1754_v52 = vld [vmem:[%s195_s26] ss:$0 sm:$0xff]  ;;  %s1866_s26 = scalar_lea.vmem (!%p1003_p5), [#allocation2], %s1016_s10 }
 0x184   : > { %v515_v54 = vpack.c.bf16 %v1062_v53, %v1059_v50 }
 0x186   : > { %v1063_v55 = vpop.f32.mrb[20].mxu0  ;;  %1177 = vmatprep.mubr.bf16.mxu1 %v515_v54 }
 0x187   : > { %v1064_v56 = vpop.f32.mrb[21].mxu0 }
 0x188   : > { %v1065_v57 = vadd.f32 %v1064_v56, %v1063_v55  ;;  %v1066_v58 = vpop.f32.mrb[22].mxu0 }
 0x189   : > { %v1067_v59 = vpop.f32.mrb[23].mxu0 }
 0x18a   : > { %v1068_v60 = vadd.f32 %v1067_v59, %v1066_v58 }
 0x18c   : > { %v516_v61 = vpack.c.bf16 %v1068_v60, %v1065_v57 }
 0x18e   : > { %v1069_v63 = vpop.f32.mrb[24].mxu0  ;;  %1178 = vmatmul.mubr.bf16.gmra.mrb[24].mxu1 %v516_v61 }
 0x18f   : > { %v1070_v0 = vpop.f32.mrb[25].mxu0 }
 0x190   : > { %v1071_v1 = vadd.f32 %v1070_v0, %v1069_v63  ;;  %v1072_v2 = vpop.f32.mrb[26].mxu0 }
 0x191   : > { %v1073_v4 = vpop.f32.mrb[27].mxu0 }
 0x192   : > { %v1074_v6 = vadd.f32 %v1073_v4, %v1072_v2 }
 0x194   : > { %v517_v7 = vpack.c.bf16 %v1074_v6, %v1071_v1 }
 0x196   : > { %v1075_v8 = vpop.f32.mrb[28].mxu0  ;;  %1181 = vmatprep.mubr.bf16.mxu1 %v517_v7 }
 0x197   : > { %v1076_v9 = vpop.f32.mrb[29].mxu0 }
 0x198   : > { %v1077_v10 = vadd.f32 %v1076_v9, %v1075_v8  ;;  %v1078_v11 = vpop.f32.mrb[30].mxu0 }
 0x199   : > { %v1079_v13 = vpop.f32.mrb[31].mxu0 }
 0x19a   : > { %v1080_v14 = vadd.f32 %v1079_v13, %v1078_v11 }
 0x19c   : > { %v518_v15 = vpack.c.bf16 %v1080_v14, %v1077_v10 }
 0x19e   : > { %v1081_v16 = vpop.f32.mrb[32].mxu0  ;;  %1182 = vmatmul.mubr.bf16.gmra.mrb[28].mxu1 %v518_v15 }
 0x19f   : > { %v1082_v18 = vpop.f32.mrb[33].mxu0 }
 0x1a0   : > { %v1083_v20 = vadd.f32 %v1082_v18, %v1081_v16  ;;  %v1084_v21 = vpop.f32.mrb[34].mxu0 }
 0x1a1   : > { %v1085_v22 = vpop.f32.mrb[35].mxu0 }
 0x1a2   : > { %v1086_v23 = vadd.f32 %v1085_v22, %v1084_v21 }
 0x1a4   : > { %v519_v24 = vpack.c.bf16 %v1086_v23, %v1083_v20 }
 0x1a6   : > { %v1087_v25 = vpop.f32.mrb[36].mxu0  ;;  %1185 = vmatprep.mubr.bf16.mxu1 %v519_v24 }
 0x1a7   : > { %v1088_v27 = vpop.f32.mrb[37].mxu0 }
 0x1a8   : > { %v1089_v28 = vadd.f32 %v1088_v27, %v1087_v25  ;;  %v1090_v29 = vpop.f32.mrb[38].mxu0 }
 0x1a9   : > { %v1091_v30 = vpop.f32.mrb[39].mxu0 }
 0x1aa   : > { %v1092_v32 = vadd.f32 %v1091_v30, %v1090_v29 }
 0x1ac   : > { %v520_v34 = vpack.c.bf16 %v1092_v32, %v1089_v28 }
 0x1ae   : > { %v1093_v35 = vpop.f32.mrb[40].mxu0  ;;  %1186 = vmatmul.mubr.bf16.gmra.mrb[32].mxu1 %v520_v34 }
 0x1af   : > { %v1094_v36 = vpop.f32.mrb[41].mxu0 }
 0x1b0   : > { %v1095_v37 = vadd.f32 %v1094_v36, %v1093_v35  ;;  %v1096_v38 = vpop.f32.mrb[42].mxu0 }
 0x1b1   : > { %v1097_v39 = vpop.f32.mrb[43].mxu0 }
 0x1b2   : > { %v1098_v41 = vadd.f32 %v1097_v39, %v1096_v38 }
 0x1b4   : > { %v521_v42 = vpack.c.bf16 %v1098_v41, %v1095_v37 }
 0x1b6   : > { %v1099_v43 = vpop.f32.mrb[44].mxu0  ;;  %1189 = vmatprep.mubr.bf16.mxu1 %v521_v42 }
 0x1b7   : > { %v1100_v44 = vpop.f32.mrb[45].mxu0 }
 0x1b8   : > { %v1101_v46 = vadd.f32 %v1100_v44, %v1099_v43  ;;  %v1102_v48 = vpop.f32.mrb[46].mxu0 }
 0x1b9   : > { %v1103_v49 = vpop.f32.mrb[47].mxu0 }
 0x1ba   : > { %v1104_v50 = vadd.f32 %v1103_v49, %v1102_v48 }
 0x1bc   : > { %v522_v51 = vpack.c.bf16 %v1104_v50, %v1101_v46 }
 0x1be   : > { %1190 = vmatmul.mubr.bf16.gmra.mrb[36].mxu1 %v522_v51 }
 0x1bf   : > { %1193 = vmatprep.mubr.bf16.mxu1 %v523_v5 }
 0x1c6   : > { %1194 = vmatmul.mubr.bf16.gmra.mrb[40].mxu1 %v524_v19 }
 0x1c7   : > { %1197 = vmatprep.mubr.bf16.mxu1 %v525_v33 }
 0x1ce   : > { %1198 = vmatmul.mubr.bf16.gmra.mrb[44].mxu1 %v526_v47 }
 0x241   : > { %v1171_v62 = vpop.f32.mrb[16].mxu1 }
 0x242   : > { %v1757_v3 = vadd.f32 %v1171_v62, %v1754_v52  ;;  %v615_v5 = vpop.f32.mrb[17].mxu1 }
 0x243   : > { %v1760_v12 = vadd.f32 %v1754_v52, %v615_v5  ;;  %v1172_v17 = vpop.f32.mrb[18].mxu1 }
 0x244   : > { %v1763_v19 = vadd.f32 %v1172_v17, %v1754_v52  ;;  %v618_v26 = vpop.f32.mrb[19].mxu1 }
 0x245   : > { %v1766_v31 = vadd.f32 %v1754_v52, %v618_v26  ;;  %v746_v5 = vmax.f32 (!%p1003_p5), %v1760_v12, 0.0  ;;  %v748_v26 = vmax.f32 (!%p1003_p5), %v1757_v3, 0.0 }
 0x247   : > { %v747_v17 = vmax.f32 (!%p1003_p5), %v1766_v31, 0.0 }
 0x251   : > { %v1175_v33 = vpop.f32.mrb[20].mxu1 }
 0x252   : > { %v1769_v40 = vadd.f32 %v1175_v33, %v1754_v52  ;;  %v631_v45 = vpop.f32.mrb[21].mxu1  ;;  %v749_v33 = vmax.f32 (!%p1003_p5), %v1763_v19, 0.0 }
 0x253   : > { %v1772_v47 = vadd.f32 %v1754_v52, %v631_v45  ;;  %v1176_v53 = vpop.f32.mrb[22].mxu1 }
 0x254   : > { %v1775_v54 = vadd.f32 %v1176_v53, %v1754_v52  ;;  %v634_v55 = vpop.f32.mrb[23].mxu1 }
 0x255   : > { %v1778_v56 = vadd.f32 %v1754_v52, %v634_v55  ;;  %v750_v45 = vmax.f32 (!%p1003_p5), %v1772_v47, 0.0 }
 0x256   : > { %v753_v55 = vmax.f32 (!%p1003_p5), %v1775_v54, 0.0 }
 0x257   : > { %v751_v53 = vmax.f32 (!%p1003_p5), %v1778_v56, 0.0 }
 0x261   : > { %v1179_v57 = vpop.f32.mrb[24].mxu1 }
 0x262   : > { %v1781_v58 = vadd.f32 %v1179_v57, %v1754_v52  ;;  %v647_v59 = vpop.f32.mrb[25].mxu1  ;;  %v778_v57 = vpack.c.bf16 (!%p1003_p5), %v747_v17, %v746_v5 }
 0x263   : > { %v1784_v60 = vadd.f32 %v1754_v52, %v647_v59  ;;  %v1180_v61 = vpop.f32.mrb[26].mxu1  ;;  %v779_v59 = vpack.c.bf16 (!%p1003_p5), %v749_v33, %v748_v26 }
 0x264   : > { %v1787_v63 = vadd.f32 %v1180_v61, %v1754_v52  ;;  %v650_v0 = vpop.f32.mrb[27].mxu1  ;;  %798 = vst [vmem:[%s1866_s26] sm:$0xff] (!%p1003_p5), %v778_v57 }
 0x265   : > { %v1790_v1 = vadd.f32 %v1754_v52, %v650_v0  ;;  %v754_v61 = vmax.f32 (!%p1003_p5), %v1784_v60, 0.0  ;;  %799 = vst [vmem:[%s1866_s26 + $0x8] sm:$0xff] (!%p1003_p5), %v779_v59 }
 0x267   : > { %v755_v0 = vmax.f32 (!%p1003_p5), %v1790_v1, 0.0 }
 0x271   : > { %v1183_v2 = vpop.f32.mrb[28].mxu1 }
 0x272   : > { %v1793_v4 = vadd.f32 %v1183_v2, %v1754_v52  ;;  %v663_v6 = vpop.f32.mrb[29].mxu1  ;;  %v780_v2 = vpack.c.bf16 (!%p1003_p5), %v751_v53, %v750_v45 }
 0x273   : > { %v1796_v7 = vadd.f32 %v1754_v52, %v663_v6  ;;  %v1184_v8 = vpop.f32.mrb[30].mxu1 }
 0x274   : > { %v1799_v9 = vadd.f32 %v1184_v8, %v1754_v52  ;;  %v666_v10 = vpop.f32.mrb[31].mxu1  ;;  %v756_v8 = vmax.f32 (!%p1003_p5), %v1781_v58, 0.0  ;;  %800 = vst [vmem:[%s1866_s26 + $0x10] sm:$0xff] (!%p1003_p5), %v780_v2 }
 0x275   : > { %v1802_v11 = vadd.f32 %v1754_v52, %v666_v10  ;;  %v757_v10 = vmax.f32 (!%p1003_p5), %v1787_v63, 0.0 }
 0x281   : > { %v1187_v13 = vpop.f32.mrb[32].mxu1 }
 0x282   : > { %v1805_v14 = vadd.f32 %v1187_v13, %v1754_v52  ;;  %v679_v15 = vpop.f32.mrb[33].mxu1  ;;  %v782_v13 = vpack.c.bf16 (!%p1003_p5), %v755_v0, %v754_v61 }
 0x283   : > { %v1808_v16 = vadd.f32 %v1754_v52, %v679_v15  ;;  %v1188_v18 = vpop.f32.mrb[34].mxu1  ;;  %v758_v15 = vmax.f32 (!%p1003_p5), %v1796_v7, 0.0 }
 0x284   : > { %v1811_v20 = vadd.f32 %v1188_v18, %v1754_v52  ;;  %v682_v21 = vpop.f32.mrb[35].mxu1  ;;  %v759_v18 = vmax.f32 (!%p1003_p5), %v1802_v11, 0.0  ;;  %802 = vst [vmem:[%s1866_s26 + $0x20] sm:$0xff] (!%p1003_p5), %v782_v13 }
 0x285   : > { %v1814_v22 = vadd.f32 %v1754_v52, %v682_v21  ;;  %v760_v21 = vmax.f32 (!%p1003_p5), %v1793_v4, 0.0 }
 0x291   : > { %v1191_v23 = vpop.f32.mrb[36].mxu1 }
 0x292   : > { %v1817_v24 = vadd.f32 %v1191_v23, %v1754_v52  ;;  %v695_v25 = vpop.f32.mrb[37].mxu1  ;;  %v783_v23 = vpack.c.bf16 (!%p1003_p5), %v757_v10, %v756_v8 }
 0x293   : > { %v1820_v27 = vadd.f32 %v1754_v52, %v695_v25  ;;  %v1192_v28 = vpop.f32.mrb[38].mxu1  ;;  %v761_v25 = vmax.f32 (!%p1003_p5), %v1799_v9, 0.0 }
 0x294   : > { %v1823_v29 = vadd.f32 %v1192_v28, %v1754_v52  ;;  %v698_v30 = vpop.f32.mrb[39].mxu1  ;;  %v762_v28 = vmax.f32 (!%p1003_p5), %v1808_v16, 0.0  ;;  %803 = vst [vmem:[%s1866_s26 + $0x28] sm:$0xff] (!%p1003_p5), %v783_v23 }
 0x295   : > { %v1826_v32 = vadd.f32 %v1754_v52, %v698_v30  ;;  %v763_v30 = vmax.f32 (!%p1003_p5), %v1814_v22, 0.0 }
 0x296   : > { %v769_v17 = vmax.f32 (!%p1003_p5), %v1823_v29, 0.0 }
 0x299   : > { %v1195_v34 = vpop.f32.mrb[40].mxu1 }
 0x29a   : > { %v1829_v35 = vadd.f32 %v1195_v34, %v1754_v52  ;;  %v711_v36 = vpop.f32.mrb[41].mxu1  ;;  %v784_v34 = vpack.c.bf16 (!%p1003_p5), %v759_v18, %v758_v15 }
 0x29b   : > { %v1832_v37 = vadd.f32 %v1754_v52, %v711_v36  ;;  %v1196_v38 = vpop.f32.mrb[42].mxu1  ;;  %v764_v36 = vmax.f32 (!%p1003_p5), %v1805_v14, 0.0 }
 0x29c   : > { %v1835_v39 = vadd.f32 %v1196_v38, %v1754_v52  ;;  %v714_v41 = vpop.f32.mrb[43].mxu1  ;;  %v765_v38 = vmax.f32 (!%p1003_p5), %v1811_v20, 0.0  ;;  %804 = vst [vmem:[%s1866_s26 + $0x30] sm:$0xff] (!%p1003_p5), %v784_v34  ;;  %v772_v53 = vmax.f32 (!%p1003_p5), %v1829_v35, 0.0 }
 0x29d   : > { %v1838_v42 = vadd.f32 %v1754_v52, %v714_v41  ;;  %v766_v41 = vmax.f32 (!%p1003_p5), %v1820_v27, 0.0  ;;  %v770_v26 = vmax.f32 (!%p1003_p5), %v1832_v37, 0.0 }
 0x29e   : > { %v787_v5 = vpack.c.bf16 (!%p1003_p5), %v765_v38, %v764_v36 }
 0x29f   : > { %745 = sbr.rel (%p1003_p5) target bundleno = 686 (0x2ae), region = 44  ;;  %v771_v33 = vmax.f32 (!%p1003_p5), %v1838_v42, 0.0 }
 0x2a0   : > { %807 = vst [vmem:[%s1866_s26 + $0x48] sm:$0xff] (!%p1003_p5), %v787_v5 }
 0x2a1   : > { %v1199_v43 = vpop.f32.mrb[44].mxu1  ;;  %v790_v59 = vpack.c.bf16 (!%p1003_p5), %v771_v33, %v770_v26 }
 0x2a2   : > { %v1841_v44 = vadd.f32 %v1199_v43, %v1754_v52  ;;  %v727_v46 = vpop.f32.mrb[45].mxu1  ;;  %v785_v43 = vpack.c.bf16 (!%p1003_p5), %v761_v25, %v760_v21 }
 0x2a3   : > { %v1844_v48 = vadd.f32 %v1754_v52, %v727_v46  ;;  %v1200_v49 = vpop.f32.mrb[46].mxu1  ;;  %v786_v46 = vpack.c.bf16 (!%p1003_p5), %v763_v30, %v762_v28  ;;  %810 = vst [vmem:[%s1866_s26 + $0x60] sm:$0xff] (!%p1003_p5), %v790_v59 }
 0x2a4   : > { %v1847_v50 = vadd.f32 %v1200_v49, %v1754_v52  ;;  %v730_v51 = vpop.f32.mrb[47].mxu1  ;;  %v767_v49 = vmax.f32 (!%p1003_p5), %v1826_v32, 0.0  ;;  %805 = vst [vmem:[%s1866_s26 + $0x38] sm:$0xff] (!%p1003_p5), %v785_v43  ;;  %v776_v0 = vmax.f32 (!%p1003_p5), %v1841_v44, 0.0 }
 0x2a5   : > { %v1850_v62 = vadd.f32 %v1754_v52, %v730_v51  ;;  %v752_v52 = vmax.f32 (!%p1003_p5), %v1769_v40, 0.0  ;;  %v768_v51 = vmax.f32 (!%p1003_p5), %v1817_v24, 0.0  ;;  %806 = vst [vmem:[%s1866_s26 + $0x40] sm:$0xff] (!%p1003_p5), %v786_v46 }
 0x2a6   : > { %v788_v45 = vpack.c.bf16 %v767_v49, %v766_v41 }
 0x2a7   : > { %v781_v6 = vpack.c.bf16 %v753_v55, %v752_v52  ;;  %v773_v52 = vmax.f32 %v1835_v39, 0.0  ;;  %v774_v55 = vmax.f32 %v1844_v48, 0.0  ;;  %v789_v57 = vpack.c.bf16 %v769_v17, %v768_v51 }
 0x2a8   : > { %v775_v61 = vmax.f32 %v1850_v62, 0.0  ;;  %808 = vst [vmem:[%s1866_s26 + $0x50] sm:$0xff] %v788_v45 }
 0x2a9   : > { %801 = vst [vmem:[%s1866_s26 + $0x18] sm:$0xff] %v781_v6  ;;  %v791_v2 = vpack.c.bf16 %v773_v52, %v772_v53  ;;  %v777_v6 = vmax.f32 %v1847_v50, 0.0  ;;  %809 = vst [vmem:[%s1866_s26 + $0x58] sm:$0xff] %v789_v57 }
 0x2aa   : > { %v792_v8 = vpack.c.bf16 %v775_v61, %v774_v55 }
 0x2ab   : > { %811 = vst [vmem:[%s1866_s26 + $0x68] sm:$0xff] %v791_v2  ;;  %v793_v10 = vpack.c.bf16 %v777_v6, %v776_v0 }
 0x2ac   : > { %812 = vst [vmem:[%s1866_s26 + $0x70] sm:$0xff] %v792_v8 }
 0x2ad   : > { %813 = vst [vmem:[%s1866_s26 + $0x78] sm:$0xff] %v793_v10 }
 0x2ae PF: > { %p1006_p7 = scmp.ne.s32.totalorder %s1455_s18, 2 }
 0x2af   : > { %817 = vst [vmem:[#allocation8] sm:$0xff] (!%p1006_p7), %v1760_v12  ;;  %818 = vst [vmem:[#allocation8 + $0x8] sm:$0xff] (!%p1006_p7), %v1766_v31 }
 0x2b0   : > { %816 = sbr.rel (%p1006_p7) target bundleno = 703 (0x2bf), region = 48  ;;  %819 = vst [vmem:[#allocation8 + $0x10] sm:$0xff] (!%p1006_p7), %v1757_v3  ;;  %820 = vst [vmem:[#allocation8 + $0x18] sm:$0xff] (!%p1006_p7), %v1763_v19 }
 0x2b1   : > { %821 = vst [vmem:[#allocation8 + $0x20] sm:$0xff] (!%p1006_p7), %v1772_v47  ;;  %822 = vst [vmem:[#allocation8 + $0x28] sm:$0xff] (!%p1006_p7), %v1778_v56 }
 0x2b2   : > { %823 = vst [vmem:[#allocation8 + $0x30] sm:$0xff] (!%p1006_p7), %v1769_v40  ;;  %824 = vst [vmem:[#allocation8 + $0x38] sm:$0xff] (!%p1006_p7), %v1775_v54 }
 0x2b3   : > { %825 = vst [vmem:[#allocation8 + $0x40] sm:$0xff] (!%p1006_p7), %v1784_v60  ;;  %826 = vst [vmem:[#allocation8 + $0x48] sm:$0xff] (!%p1006_p7), %v1790_v1 }
 0x2b4   : > { %827 = vst [vmem:[#allocation8 + $0x50] sm:$0xff] (!%p1006_p7), %v1781_v58  ;;  %828 = vst [vmem:[#allocation8 + $0x58] sm:$0xff] (!%p1006_p7), %v1787_v63 }
 0x2b5   : > { %829 = vst [vmem:[#allocation8 + $0x60] sm:$0xff] (!%p1006_p7), %v1796_v7  ;;  %830 = vst [vmem:[#allocation8 + $0x68] sm:$0xff] (!%p1006_p7), %v1802_v11 }
 0x2b6   : > { %831 = vst [vmem:[#allocation8 + $0x70] sm:$0xff] (!%p1006_p7), %v1793_v4  ;;  %832 = vst [vmem:[#allocation8 + $0x78] sm:$0xff] (!%p1006_p7), %v1799_v9 }
 0x2b7   : > { %833 = vst [vmem:[#allocation8 + $0x80] sm:$0xff] %v1808_v16  ;;  %834 = vst [vmem:[#allocation8 + $0x88] sm:$0xff] %v1814_v22 }
 0x2b8   : > { %835 = vst [vmem:[#allocation8 + $0x90] sm:$0xff] %v1805_v14  ;;  %836 = vst [vmem:[#allocation8 + $0x98] sm:$0xff] %v1811_v20 }
 0x2b9   : > { %837 = vst [vmem:[#allocation8 + $0xa0] sm:$0xff] %v1820_v27  ;;  %838 = vst [vmem:[#allocation8 + $0xa8] sm:$0xff] %v1826_v32 }
 0x2ba   : > { %839 = vst [vmem:[#allocation8 + $0xb0] sm:$0xff] %v1817_v24  ;;  %840 = vst [vmem:[#allocation8 + $0xb8] sm:$0xff] %v1823_v29 }
 0x2bb   : > { %841 = vst [vmem:[#allocation8 + $0xc0] sm:$0xff] %v1832_v37  ;;  %842 = vst [vmem:[#allocation8 + $0xc8] sm:$0xff] %v1838_v42 }
 0x2bc   : > { %843 = vst [vmem:[#allocation8 + $0xd0] sm:$0xff] %v1829_v35  ;;  %844 = vst [vmem:[#allocation8 + $0xd8] sm:$0xff] %v1835_v39 }
 0x2bd   : > { %845 = vst [vmem:[#allocation8 + $0xe0] sm:$0xff] %v1844_v48  ;;  %846 = vst [vmem:[#allocation8 + $0xe8] sm:$0xff] %v1850_v62 }
 0x2be   : > { %847 = vst [vmem:[#allocation8 + $0xf0] sm:$0xff] %v1841_v44  ;;  %848 = vst [vmem:[#allocation8 + $0xf8] sm:$0xff] %v1847_v50 }
 0x2bf PF: > { %p1939_p6 = scmp.eq.s32.totalorder %s977_s21, 2  ;;  %s1478_s30 = smov [#allocation8]  }
 0x2c0   : > { %s866_s13 = sshll.u32 %s1478_s30, 4  ;;  %s867_s13 = int_to_ptr.vmem [resolvable:$true] %s866_s13 }
 0x2c1   : > { %s1375_s28 = scalar_lea.vmem %s867_s13, 4096  ;;  %s1381_s7 = scalar_lea.vmem %s867_s13, 8192 }
 0x2c2   : > { %p1376_p8 = scmp.ne.s32.totalorder %s867_s13, %s1375_s28  ;;  %p1382_p1 = scmp.lt.s32.totalorder %s867_s13, %s867_s13 }
 0x2c3   : > { %p1383_p2 = scmp.lt.s32.totalorder %s1381_s7, %s1375_s28 }
 0x2c4   : > { %p1377_p11 = pnand %p1376_p8, %p1939_p6 }
 0x2c5   : > { %p1384_p3 = por %p1383_p2, %p1382_p1 }
 0x2c6   : > { %p1378_p13 = pneg %p1377_p11 }
 0x2c8   : > { %p1385_p12 = pnand %p1384_p3, %p1378_p13 }
 0x2ca   : > { %1388 = shalt.err (!%p1385_p12)
}
 0x2cb   : > { %s1389_s9 = scalar_lea.hbm %s1986_s4, 4096 }
 0x2cc   : > { %p1390_p0 = scmp.ne.s32.totalorder %s1986_s4, %s1389_s9  ;;  %p1395_p10 = scmp.lt.u32.totalorder %s1389_s9, %s1986_s4 }
 0x2ce   : > { %p1391_p4 = pnand %p1390_p0, %p1939_p6 }
 0x2d0   : > { %p1392_p9 = pneg %p1391_p4 }
 0x2d2   : > { %p1397_p5 = pnand %p1395_p10, %p1392_p9 }
 0x2d4   : > { %1400 = shalt.err (!%p1397_p5)
}
 0x2d5   : > { %s1479_s25 = smov 128   ;;  %s1480_s12 = smov 8  }
 0x2d6   : > { %1234 = dma.vmem_to_hbm [thread:$0]  (%p1939_p6), %s867_s13, 4096, %s1986_s4, [#allocation7], %s1479_s25, %s1479_s25, %s1480_s12  }
 0x2d7 PF: > { %p1247_p7 = scmp.ge.s32.totalorder %s1463_s20, 2  ;;  %p1248_p8 = scmp.eq.s32.totalorder %s978_s22, 2 }
 0x2d9   : > { %p1242_p11 = pnand %p1248_p8, %p1247_p7 }
 0x2db   : > { %1438 = dma.done.wait (!%p1242_p11), [#allocation7], 4096  }
 0x2dc   : > { %1440 = vsyncadd (!%p1242_p11), [#allocation7], 4294963200  ;;  %s20_s20 = sadd.s32 1, %s1463_s20   ;;  %s1992_s15 = smov %s1447_s16 }
 0x2dd   : > { %p17_p13 = scmp.ge.s32.totalorder %s20_s20, 5   ;;  %s1993_s16 = smov %s1451_s17 }
 0x2de   : > { %s1994_s17 = smov %s1559_s29  ;;  %s1995_s18 = smov %s1459_s19 }
 0x2df   : > { %s1996_s19 = smov %s1998_s23  ;;  %19 = sbr.rel (!%p17_p13) target bundleno = 6 (0x6), region = 106 }
 0x2e6   :  { %887 = vsyncpa [#allocation6], 1 }
 0x2e7   :  { %889 = vsyncpa [#allocation6 + $0x1], 1 }
 0x2e8   :  { %890 = vsyncpa [#allocation7], 1 }
 0x2e9   :  { %892 = vsyncpa [#allocation7 + $0x1], 1 }
 0x2ea   :  { %893 = vsyncmov [#allocation4] }
 0x2ed   :  { %s894_s22 = vpop.sfrf %893 }
 0x2ee   :  { %p1011_p6 = scmp.ne.s32.totalorder %s894_s22, 0 }
 0x2f0   :  { %898 = shalt.err (%p1011_p6)  }
 0x2f1   :  { %900 = vsyncmov [#allocation4 + $0x1] }
 0x2f4   :  { %s901_s5 = vpop.sfrf %900 }
 0x2f5   :  { %p1012_p1 = scmp.ne.s32.totalorder %s901_s5, 0 }
 0x2f7   :  { %905 = shalt.err (%p1012_p1)  }

</bundles_post_ra>
